<compile_context>
chip_gen: v5e
topology: v5e:2x2
jax: 0.10.0
libtpu: 0.0.40
codegen_flags: <defaults>
</compile_context>

<pallas_src>
import jax
import jax.numpy as jnp
from jax.experimental import pallas as pl
from jax.experimental.pallas import tpu as pltpu

_NEG_INF = float("-inf")
_POS_INF = float("inf")


def _round_up(x, m):
    return (x + m - 1) // m * m


def _cdiv(a, b):
    return (a + b - 1) // b


def _default_apply_dtype():
    """bf16 apply stage only where the VPU/EUP are bf16-capable (v6e/v7x)."""
    try:
        kind = jax.devices()[0].device_kind.lower()
    except Exception:
        return jnp.float32
    if any(tag in kind for tag in ("v6", "v7", "tpu7")):
        return jnp.bfloat16
    return jnp.float32


def _make_topk_mask_kernel(k, evaluation, use_unrolled, bisect_iters, apply_dtype):
    """Kernel body for static keep-count `k`, eval flag, and threshold mode."""
    k = int(k)

    def kernel(tau_ref, x_ref, y_ref, m_ref):
        rows = x_ref.shape[0]

        # ---- per-row threshold: k-th order statistic ------------------------
        if use_unrolled:
            # Small k: k unrolled max-reduce passes. A per-row `remaining`
            # counter makes this tie-exact (k-th largest WITH multiplicity,
            # matching torch.topk / jax.lax.top_k).
            running = x_ref[...].astype(jnp.float32)
            remaining = jnp.full((rows, 1), float(k), dtype=jnp.float32)
            thr = jnp.full((rows, 1), _NEG_INF, dtype=jnp.float32)
            for _ in range(k):
                cur = jnp.max(running, axis=-1, keepdims=True)
                thr = jnp.where(remaining > 0.5, cur, thr)
                ge = running >= cur
                remaining = remaining - jnp.sum(
                    ge.astype(jnp.float32), axis=-1, keepdims=True)
                running = jnp.where(ge, _NEG_INF, running)
            # Re-read so only thr stays live across the sweep.
            x = x_ref[...].astype(jnp.float32)
        else:
            # Large k: k-independent count-based bisection on the per-row data
            # range (no pad columns, so lo/hi are data-tight), unrolled so the
            # LLO scheduler sees the whole chain, then snap the threshold to
            # the smallest element >= lo so it is an actual data value.
            xv = x_ref[...].astype(jnp.float32)
            lo = jnp.min(xv, axis=-1, keepdims=True)
            hi = jnp.max(xv, axis=-1, keepdims=True)
            kf = float(k)
            for _ in range(bisect_iters):      # serially dependent; unrolled
                mid = 0.5 * (lo + hi)
                cnt = jnp.sum((xv >= mid).astype(jnp.float32),
                              axis=-1, keepdims=True)
                inside = cnt >= kf
                lo = jnp.where(inside, mid, lo)
                hi = jnp.where(inside, hi, mid)
            thr = jnp.min(jnp.where(xv >= lo, xv, _POS_INF),
                          axis=-1, keepdims=True)
            x = xv   # xv is live through the snap anyway: reuse, no re-read.

        # ---- mask + masked output -------------------------------------------
        if evaluation:
            keep = x >= thr
            y_ref[...] = jnp.where(keep, x, 0.0).astype(y_ref.dtype)
            m_ref[...] = keep.astype(m_ref.dtype)
        else:
            inv_tau = 1.0 / tau_ref[0]          # one scalar op per grid step
            # Difference in f32 (avoids cancellation), sigmoid + multiply in
            # apply_dtype (bf16 on v6e/v7x for 2x EUP/VPU throughput).
            arg = ((x - thr) * inv_tau).astype(apply_dtype)
            mask = jax.nn.sigmoid(arg)
            y_ref[...] = (x.astype(apply_dtype) * mask).astype(y_ref.dtype)
            m_ref[...] = mask.astype(m_ref.dtype)

    return kernel


def topk_mask_forward(x, tau, *, topk_keep_num, topk_apply_dim="spatial",
                      evaluation=False, mask_dtype=jnp.bfloat16,
                      apply_dtype=None, unrolled_max_k=8, bisect_iters=24,
                      block_target_elems=256 * 1024):
    """TopKMaskBase forward. Returns (x * mask, mask).

    y is returned in x.dtype; the mask in `mask_dtype` (bf16 by default to
    halve the mask's HBM write traffic; pass jnp.float32 for full precision).
    `apply_dtype=None` picks bf16 for the training apply stage on v6e/v7x and
    f32 elsewhere; pass jnp.float32 to force exact f32 apply.
    """
    if topk_apply_dim not in ("spatial", -1, None):
        # TODO(synk): channel-dim top-k would need a wrapper transpose.
        raise NotImplementedError("only flattened-spatial top-k is implemented")
    if x.ndim != 4:
        raise ValueError("expected NCHW input")

    N, C, H, W = x.shape
    HW = H * W
    R = N * C
    k = int(min(max(int(topk_keep_num), 1), HW))   # clamp: 1 <= k <= HW
    in_dtype = x.dtype
    if apply_dtype is None:
        apply_dtype = _default_apply_dtype()

    # Row tile: multiple of 16 sublanes (bf16-output safe), sized to VMEM.
    tr_cap = max(16, min((block_target_elems // max(HW, 1)) // 16 * 16, 1024))
    if R <= tr_cap:
        if R >= 32:
            # v7x has two TensorCores: give the "parallel" row axis >=2 steps.
            TR = _round_up(_cdiv(R, 2), 16)
        else:
            TR = R          # single full-extent block (always layout-legal)
    else:
        TR = tr_cap
    grid_r = _cdiv(R, TR)   # ragged last block OK: rows are independent and
                            # out-of-range writes are discarded.

    xr = x.reshape(R, HW)   # free reshape; NO pad, NO output slices.
    tau_arr = jnp.asarray([tau], dtype=jnp.float32)

    kernel = _make_topk_mask_kernel(
        k, evaluation, use_unrolled=(k <= unrolled_max_k),
        bisect_iters=bisect_iters, apply_dtype=apply_dtype)

    y, m = pl.pallas_call(
        kernel,
        out_shape=(
            jax.ShapeDtypeStruct((R, HW), in_dtype),    # masked x, native dtype
            jax.ShapeDtypeStruct((R, HW), mask_dtype),  # mask, narrow dtype
        ),
        grid=(grid_r,),
        in_specs=[
            # tau scalar lives in SMEM, shared across all grid steps.
            pl.BlockSpec(memory_space=pltpu.MemorySpace.SMEM),
            pl.BlockSpec((TR, HW), lambda r: (r, 0)),
        ],
        out_specs=(
            pl.BlockSpec((TR, HW), lambda r: (r, 0)),
            pl.BlockSpec((TR, HW), lambda r: (r, 0)),
        ),
        compiler_params=pltpu.CompilerParams(
            dimension_semantics=("parallel",),
            vmem_limit_bytes=32 * 1024 * 1024,
        ),
    )(tau_arr, xr)

    return y.reshape(N, C, H, W), m.reshape(N, C, H, W)


def _reference(x, tau, k, evaluation):
    """Pure-JAX reference (jax.lax.top_k semantics, incl. ties)."""
    N, C, H, W = x.shape
    xf = x.reshape(N, C, H * W).astype(jnp.float32)
    thr = jax.lax.top_k(xf, k)[0][..., -1:]        # k-th largest (with ties)
    if evaluation:
        mask = (xf >= thr).astype(jnp.float32)
    else:
        mask = jax.nn.sigmoid((xf - thr) / tau)
    return (xf * mask).reshape(N, C, H, W), mask.reshape(N, C, H, W)


if __name__ == "__main__":
    key = jax.random.PRNGKey(0)
    # Small shapes consistent with the module: batch=2, channels=4, reso=16.
    x = jax.random.normal(key, (2, 4, 16, 16), dtype=jnp.float32)
    tau = 0.5

    def check(xx, k, evaluation, y_tol, m_tol, **kw):
        y, m = topk_mask_forward(xx, tau, topk_keep_num=k,
                                 evaluation=evaluation, **kw)
        jax.block_until_ready((y, m))
        y_ref, m_ref = _reference(xx, tau, k, evaluation)
        assert y.dtype == xx.dtype
        assert jnp.allclose(y.astype(jnp.float32), y_ref,
                            atol=y_tol, rtol=y_tol), (k, evaluation, "y")
        assert jnp.allclose(m.astype(jnp.float32), m_ref,
                            atol=m_tol, rtol=m_tol), (k, evaluation, "mask")

    # Small-k unrolled path: training (soft, exact f32 apply) + eval (hard).
    check(x, 8, False, 1e-5, 1e-2, apply_dtype=jnp.float32)
    check(x, 8, True, 1e-5, 1e-2)

    # Tie-heavy input: exact k-th order statistic (torch.topk semantics).
    xq = jnp.round(x * 2.0) / 2.0
    check(xq, 5, False, 1e-5, 1e-2, apply_dtype=jnp.float32)
    check(xq, 5, True, 1e-5, 1e-2)

    # Large-k path: unrolled count-based bisection threshold (train + eval).
    check(x, 40, False, 1e-5, 1e-2, apply_dtype=jnp.float32)
    check(x, 40, True, 1e-5, 1e-2)

    # Narrow-dtype input: y returned in bf16, threshold search stays f32.
    check(x.astype(jnp.bfloat16), 8, False, 2e-2, 1e-2, apply_dtype=jnp.float32)

    # bf16 apply stage (v6e/v7x fast path) — looser tolerances by construction.
    check(x, 8, False, 3e-2, 3e-2, apply_dtype=jnp.bfloat16)
    check(x, 40, False, 3e-2, 3e-2, apply_dtype=jnp.bfloat16)

    print("KERNEL_OK")
</pallas_src>

<mosaic_0001>
module attributes {stable_mosaic.version = 11 : i64} {
  func.func @kernel(%arg0: i32, %arg1: memref<1xf32, #tpu.memory_space<smem>>, %arg2: memref<8x256xf32, #tpu.memory_space<vmem>>, %arg3: memref<8x256xf32, #tpu.memory_space<vmem>>, %arg4: memref<8x256xbf16, #tpu.memory_space<vmem>>) attributes {dimension_semantics = [#tpu.dimension_semantics<parallel>], iteration_bounds = array<i64: 1>, scalar_prefetch = 0 : i64, scratch_operands = 0 : i64, tpu.core_type = #tpu.core_type<tc>, window_params = [{transform_indices = @transform_0, window_bounds = array<i64: 1>}, {transform_indices = @transform_1, window_bounds = array<i64: 8, 256>}, {transform_indices = @transform_2, window_bounds = array<i64: 8, 256>}, {transform_indices = @transform_3, window_bounds = array<i64: 8, 256>}]} {
    %c0 = arith.constant 0 : index
    %c0_0 = arith.constant 0 : index
    %0 = vector.load %arg2[%c0, %c0_0] : memref<8x256xf32, #tpu.memory_space<vmem>>, vector<8x256xf32>
    %cst = arith.constant 8.000000e+00 : f32
    %1 = vector.broadcast %cst : f32 to vector<8x1xf32>
    %cst_1 = arith.constant 0xFF800000 : f32
    %2 = vector.broadcast %cst_1 : f32 to vector<8x1xf32>
    %cst_2 = arith.constant dense<0xFF800000> : vector<8xf32>
    %3 = vector.multi_reduction <maximumf>, %0, %cst_2 [1] : vector<8x256xf32> to vector<8xf32>
    %4 = vector.shape_cast %3 : vector<8xf32> to vector<8x1xf32>
    %cst_3 = arith.constant 5.000000e-01 : f32
    %5 = vector.broadcast %cst_3 : f32 to vector<8x1xf32>
    %6 = arith.cmpf ogt, %1, %5 : vector<8x1xf32>
    %7 = arith.select %6, %4, %2 : vector<8x1xi1>, vector<8x1xf32>
    %8 = vector.broadcast %4 : vector<8x1xf32> to vector<8x256xf32>
    %9 = arith.cmpf oge, %0, %8 : vector<8x256xf32>
    %10 = arith.extui %9 : vector<8x256xi1> to vector<8x256xi32>
    %11 = arith.sitofp %10 : vector<8x256xi32> to vector<8x256xf32>
    %cst_4 = arith.constant dense<0.000000e+00> : vector<8xf32>
    %12 = vector.multi_reduction <add>, %11, %cst_4 [1] : vector<8x256xf32> to vector<8xf32>
    %13 = vector.shape_cast %12 : vector<8xf32> to vector<8x1xf32>
    %14 = arith.subf %1, %13 : vector<8x1xf32>
    %cst_5 = arith.constant 0xFF800000 : f32
    %15 = vector.broadcast %cst_5 : f32 to vector<8x256xf32>
    %16 = arith.select %9, %15, %0 : vector<8x256xi1>, vector<8x256xf32>
    %cst_6 = arith.constant dense<0xFF800000> : vector<8xf32>
    %17 = vector.multi_reduction <maximumf>, %16, %cst_6 [1] : vector<8x256xf32> to vector<8xf32>
    %18 = vector.shape_cast %17 : vector<8xf32> to vector<8x1xf32>
    %cst_7 = arith.constant 5.000000e-01 : f32
    %19 = vector.broadcast %cst_7 : f32 to vector<8x1xf32>
    %20 = arith.cmpf ogt, %14, %19 : vector<8x1xf32>
    %21 = arith.select %20, %18, %7 : vector<8x1xi1>, vector<8x1xf32>
    %22 = vector.broadcast %18 : vector<8x1xf32> to vector<8x256xf32>
    %23 = arith.cmpf oge, %16, %22 : vector<8x256xf32>
    %24 = arith.extui %23 : vector<8x256xi1> to vector<8x256xi32>
    %25 = arith.sitofp %24 : vector<8x256xi32> to vector<8x256xf32>
    %cst_8 = arith.constant dense<0.000000e+00> : vector<8xf32>
    %26 = vector.multi_reduction <add>, %25, %cst_8 [1] : vector<8x256xf32> to vector<8xf32>
    %27 = vector.shape_cast %26 : vector<8xf32> to vector<8x1xf32>
    %28 = arith.subf %14, %27 : vector<8x1xf32>
    %cst_9 = arith.constant 0xFF800000 : f32
    %29 = vector.broadcast %cst_9 : f32 to vector<8x256xf32>
    %30 = arith.select %23, %29, %16 : vector<8x256xi1>, vector<8x256xf32>
    %cst_10 = arith.constant dense<0xFF800000> : vector<8xf32>
    %31 = vector.multi_reduction <maximumf>, %30, %cst_10 [1] : vector<8x256xf32> to vector<8xf32>
    %32 = vector.shape_cast %31 : vector<8xf32> to vector<8x1xf32>
    %cst_11 = arith.constant 5.000000e-01 : f32
    %33 = vector.broadcast %cst_11 : f32 to vector<8x1xf32>
    %34 = arith.cmpf ogt, %28, %33 : vector<8x1xf32>
    %35 = arith.select %34, %32, %21 : vector<8x1xi1>, vector<8x1xf32>
    %36 = vector.broadcast %32 : vector<8x1xf32> to vector<8x256xf32>
    %37 = arith.cmpf oge, %30, %36 : vector<8x256xf32>
    %38 = arith.extui %37 : vector<8x256xi1> to vector<8x256xi32>
    %39 = arith.sitofp %38 : vector<8x256xi32> to vector<8x256xf32>
    %cst_12 = arith.constant dense<0.000000e+00> : vector<8xf32>
    %40 = vector.multi_reduction <add>, %39, %cst_12 [1] : vector<8x256xf32> to vector<8xf32>
    %41 = vector.shape_cast %40 : vector<8xf32> to vector<8x1xf32>
    %42 = arith.subf %28, %41 : vector<8x1xf32>
    %cst_13 = arith.constant 0xFF800000 : f32
    %43 = vector.broadcast %cst_13 : f32 to vector<8x256xf32>
    %44 = arith.select %37, %43, %30 : vector<8x256xi1>, vector<8x256xf32>
    %cst_14 = arith.constant dense<0xFF800000> : vector<8xf32>
    %45 = vector.multi_reduction <maximumf>, %44, %cst_14 [1] : vector<8x256xf32> to vector<8xf32>
    %46 = vector.shape_cast %45 : vector<8xf32> to vector<8x1xf32>
    %cst_15 = arith.constant 5.000000e-01 : f32
    %47 = vector.broadcast %cst_15 : f32 to vector<8x1xf32>
    %48 = arith.cmpf ogt, %42, %47 : vector<8x1xf32>
    %49 = arith.select %48, %46, %35 : vector<8x1xi1>, vector<8x1xf32>
    %50 = vector.broadcast %46 : vector<8x1xf32> to vector<8x256xf32>
    %51 = arith.cmpf oge, %44, %50 : vector<8x256xf32>
    %52 = arith.extui %51 : vector<8x256xi1> to vector<8x256xi32>
    %53 = arith.sitofp %52 : vector<8x256xi32> to vector<8x256xf32>
    %cst_16 = arith.constant dense<0.000000e+00> : vector<8xf32>
    %54 = vector.multi_reduction <add>, %53, %cst_16 [1] : vector<8x256xf32> to vector<8xf32>
    %55 = vector.shape_cast %54 : vector<8xf32> to vector<8x1xf32>
    %56 = arith.subf %42, %55 : vector<8x1xf32>
    %cst_17 = arith.constant 0xFF800000 : f32
    %57 = vector.broadcast %cst_17 : f32 to vector<8x256xf32>
    %58 = arith.select %51, %57, %44 : vector<8x256xi1>, vector<8x256xf32>
    %cst_18 = arith.constant dense<0xFF800000> : vector<8xf32>
    %59 = vector.multi_reduction <maximumf>, %58, %cst_18 [1] : vector<8x256xf32> to vector<8xf32>
    %60 = vector.shape_cast %59 : vector<8xf32> to vector<8x1xf32>
    %cst_19 = arith.constant 5.000000e-01 : f32
    %61 = vector.broadcast %cst_19 : f32 to vector<8x1xf32>
    %62 = arith.cmpf ogt, %56, %61 : vector<8x1xf32>
    %63 = arith.select %62, %60, %49 : vector<8x1xi1>, vector<8x1xf32>
    %64 = vector.broadcast %60 : vector<8x1xf32> to vector<8x256xf32>
    %65 = arith.cmpf oge, %58, %64 : vector<8x256xf32>
    %66 = arith.extui %65 : vector<8x256xi1> to vector<8x256xi32>
    %67 = arith.sitofp %66 : vector<8x256xi32> to vector<8x256xf32>
    %cst_20 = arith.constant dense<0.000000e+00> : vector<8xf32>
    %68 = vector.multi_reduction <add>, %67, %cst_20 [1] : vector<8x256xf32> to vector<8xf32>
    %69 = vector.shape_cast %68 : vector<8xf32> to vector<8x1xf32>
    %70 = arith.subf %56, %69 : vector<8x1xf32>
    %cst_21 = arith.constant 0xFF800000 : f32
    %71 = vector.broadcast %cst_21 : f32 to vector<8x256xf32>
    %72 = arith.select %65, %71, %58 : vector<8x256xi1>, vector<8x256xf32>
    %cst_22 = arith.constant dense<0xFF800000> : vector<8xf32>
    %73 = vector.multi_reduction <maximumf>, %72, %cst_22 [1] : vector<8x256xf32> to vector<8xf32>
    %74 = vector.shape_cast %73 : vector<8xf32> to vector<8x1xf32>
    %cst_23 = arith.constant 5.000000e-01 : f32
    %75 = vector.broadcast %cst_23 : f32 to vector<8x1xf32>
    %76 = arith.cmpf ogt, %70, %75 : vector<8x1xf32>
    %77 = arith.select %76, %74, %63 : vector<8x1xi1>, vector<8x1xf32>
    %78 = vector.broadcast %74 : vector<8x1xf32> to vector<8x256xf32>
    %79 = arith.cmpf oge, %72, %78 : vector<8x256xf32>
    %80 = arith.extui %79 : vector<8x256xi1> to vector<8x256xi32>
    %81 = arith.sitofp %80 : vector<8x256xi32> to vector<8x256xf32>
    %cst_24 = arith.constant dense<0.000000e+00> : vector<8xf32>
    %82 = vector.multi_reduction <add>, %81, %cst_24 [1] : vector<8x256xf32> to vector<8xf32>
    %83 = vector.shape_cast %82 : vector<8xf32> to vector<8x1xf32>
    %84 = arith.subf %70, %83 : vector<8x1xf32>
    %cst_25 = arith.constant 0xFF800000 : f32
    %85 = vector.broadcast %cst_25 : f32 to vector<8x256xf32>
    %86 = arith.select %79, %85, %72 : vector<8x256xi1>, vector<8x256xf32>
    %cst_26 = arith.constant dense<0xFF800000> : vector<8xf32>
    %87 = vector.multi_reduction <maximumf>, %86, %cst_26 [1] : vector<8x256xf32> to vector<8xf32>
    %88 = vector.shape_cast %87 : vector<8xf32> to vector<8x1xf32>
    %cst_27 = arith.constant 5.000000e-01 : f32
    %89 = vector.broadcast %cst_27 : f32 to vector<8x1xf32>
    %90 = arith.cmpf ogt, %84, %89 : vector<8x1xf32>
    %91 = arith.select %90, %88, %77 : vector<8x1xi1>, vector<8x1xf32>
    %92 = vector.broadcast %88 : vector<8x1xf32> to vector<8x256xf32>
    %93 = arith.cmpf oge, %86, %92 : vector<8x256xf32>
    %94 = arith.extui %93 : vector<8x256xi1> to vector<8x256xi32>
    %95 = arith.sitofp %94 : vector<8x256xi32> to vector<8x256xf32>
    %cst_28 = arith.constant dense<0.000000e+00> : vector<8xf32>
    %96 = vector.multi_reduction <add>, %95, %cst_28 [1] : vector<8x256xf32> to vector<8xf32>
    %97 = vector.shape_cast %96 : vector<8xf32> to vector<8x1xf32>
    %98 = arith.subf %84, %97 : vector<8x1xf32>
    %cst_29 = arith.constant 0xFF800000 : f32
    %99 = vector.broadcast %cst_29 : f32 to vector<8x256xf32>
    %100 = arith.select %93, %99, %86 : vector<8x256xi1>, vector<8x256xf32>
    %cst_30 = arith.constant dense<0xFF800000> : vector<8xf32>
    %101 = vector.multi_reduction <maximumf>, %100, %cst_30 [1] : vector<8x256xf32> to vector<8xf32>
    %102 = vector.shape_cast %101 : vector<8xf32> to vector<8x1xf32>
    %cst_31 = arith.constant 5.000000e-01 : f32
    %103 = vector.broadcast %cst_31 : f32 to vector<8x1xf32>
    %104 = arith.cmpf ogt, %98, %103 : vector<8x1xf32>
    %105 = arith.select %104, %102, %91 : vector<8x1xi1>, vector<8x1xf32>
    %c0_32 = arith.constant 0 : index
    %c0_33 = arith.constant 0 : index
    %106 = vector.load %arg2[%c0_32, %c0_33] : memref<8x256xf32, #tpu.memory_space<vmem>>, vector<8x256xf32>
    %c0_34 = arith.constant 0 : index
    %107 = memref.load %arg1[%c0_34] : memref<1xf32, #tpu.memory_space<smem>>
    %cst_35 = arith.constant 1.000000e+00 : f32
    %108 = arith.divf %cst_35, %107 : f32
    %109 = vector.broadcast %105 : vector<8x1xf32> to vector<8x256xf32>
    %110 = arith.subf %106, %109 : vector<8x256xf32>
    %111 = vector.broadcast %108 : f32 to vector<8x256xf32>
    %112 = arith.mulf %110, %111 : vector<8x256xf32>
    %113 = arith.negf %112 : vector<8x256xf32>
    %114 = math.exp %113 : vector<8x256xf32>
    %cst_36 = arith.constant 1.000000e+00 : f32
    %115 = vector.broadcast %cst_36 : f32 to vector<8x256xf32>
    %116 = arith.addf %115, %114 : vector<8x256xf32>
    %117 = arith.divf %115, %116 : vector<8x256xf32>
    %118 = arith.mulf %106, %117 : vector<8x256xf32>
    %c0_37 = arith.constant 0 : index
    %c0_38 = arith.constant 0 : index
    %119 = vector.load %arg3[%c0_37, %c0_38] : memref<8x256xf32, #tpu.memory_space<vmem>>, vector<8x256xf32>
    tpu.vector_store %arg3[%c0_37, %c0_38], %118 {strides = array<i32>} : memref<8x256xf32, #tpu.memory_space<vmem>>, vector<8x256xf32>,
    %120 = arith.truncf %117 : vector<8x256xf32> to vector<8x256xbf16>
    %c0_39 = arith.constant 0 : index
    %c0_40 = arith.constant 0 : index
    %121 = vector.load %arg4[%c0_39, %c0_40] : memref<8x256xbf16, #tpu.memory_space<vmem>>, vector<8x256xbf16>
    tpu.vector_store %arg4[%c0_39, %c0_40], %120 {strides = array<i32>} : memref<8x256xbf16, #tpu.memory_space<vmem>>, vector<8x256xbf16>,
    return
  }
  func.func @transform_0(%arg0: i32) -> i32 {
    %c0_i32 = arith.constant 0 : i32
    %c0_i32_0 = arith.constant 0 : i32
    return %c0_i32 : i32
  }
  func.func @transform_1(%arg0: i32) -> (i32, i32) {
    %c0_i32 = arith.constant 0 : i32
    %c0_i32_0 = arith.constant 0 : i32
    return %arg0, %c0_i32 : i32, i32
  }
  func.func @transform_2(%arg0: i32) -> (i32, i32) {
    %c0_i32 = arith.constant 0 : i32
    %c0_i32_0 = arith.constant 0 : i32
    return %arg0, %c0_i32 : i32, i32
  }
  func.func @transform_3(%arg0: i32) -> (i32, i32) {
    %c0_i32 = arith.constant 0 : i32
    %c0_i32_0 = arith.constant 0 : i32
    return %arg0, %c0_i32 : i32, i32
  }
}

</mosaic_0001>

<bundles_post_ra>
// kernel: tpu_custom_call.1
= control target key start
LH: loop header
LB: loop body
LE: loop exit
PB: predicated region body
PF: predicated region fallthrough
CT: control target
= control target key end

     0   :  { %10 = vsyncpa [#allocation4], 0  ;;  %s459_s0 = inlined_call_operand.<no memory space> [shape: f32[1], index: 0, kind: input, shape index: {}]   ;;  %s460_s1 = inlined_call_operand.hbm [shape: f32[8,256], index: 1, kind: input, shape index: {}]   ;;  %s461_s2 = inlined_call_operand.hbm [shape: f32[8,256], index: 2, kind: output, shape index: {0}]   ;;  %s462_s3 = inlined_call_operand.hbm [shape: bf16[8,256], index: 3, kind: output, shape index: {1}]  }
   0x1   :  { %11 = vsyncpa [#allocation5], 0 }
   0x2   :  { %12 = vsyncpa [#allocation8], 0  ;;  %s20_s14 = sshll.u32 %s460_s1, 4  ;;  %s365_s15 = smov [#allocation3]   ;;  %s21_s14 = int_to_ptr.hbm [resolvable:$true] %s20_s14 }
   0x3   :  { %s22_s16 = sshll.u32 %s365_s15, 4  ;;  %s23_s16 = int_to_ptr.vmem [resolvable:$true] %s22_s16 }
   0x4   :  { %25 = dma.hbm_to_vmem [thread:$0]  %s21_s14, 256, %s23_s16, [#allocation4]  }
   0x5   :  { %359 = dma.done.wait [#allocation4], 256  }
   0x6   :  { %360 = vsyncadd [#allocation4], 4294967040  ;;  %v392_v0 = vld [vmem:[#allocation3] sm:$0xff]  ;;  %v394_v1 = vld [vmem:[#allocation3 + $0x8] sm:$0xff]  ;;  %v366_v6 = vmov 0.0   ;;  %v157_v46 = vstv %s459_s0  ;;  %s367_s18 = smov [#allocation6]  }
   0x7   :  { %v32_v2 = vmax.f32 %v392_v0, %v394_v1  ;;  %277 = vrcp.f32 %v157_v46  ;;  %v169_v49 = vand.u32 2147483648, %v157_v46  ;;  %vm163_vm12 = vweird.f32 %v157_v46  ;;  %s227_s19 = sshll.u32 %s367_s18, 4  ;;  %s229_s22 = sshll.u32 %s461_s2, 4  ;;  %s228_s19 = int_to_ptr.vmem [resolvable:$true] %s227_s19  ;;  %s230_s22 = int_to_ptr.hbm [resolvable:$true] %s229_s22 }
   0x8   :  { %v167_v51 = vand.u32 2147483647, %v157_v46  ;;  %s368_s23 = smov [#allocation7]   ;;  %s240_s27 = sshll.u32 %s462_s3, 4  ;;  %s241_s27 = int_to_ptr.hbm [resolvable:$true] %s240_s27 }
   0x9   :  { %33 = vmax.xlane.f32.xlu0 %v32_v2  ;;  %v170_v54 = vor.u32 1.1754944e-38, %v169_v49  ;;  %s238_s24 = sshll.u32 %s368_s23, 4  ;;  %s239_s24 = int_to_ptr.vmem [resolvable:$true] %s238_s24 }
   0xd   :  { %v278_v47 = vpop.eup %277 }
   0xe   :  { %v159_v48 = vmul.f32 %v278_v47, %v157_v46  ;;  %vm164_vm13 = vweird.f32 %v278_v47 }
  0x10   :  { %v160_v50 = vsub.f32 1.0, %v159_v48 }
  0x12   :  { %v161_v53 = vmul.f32 %v278_v47, %v160_v50 }
  0x14   :  { %v162_v61 = vadd.f32 %v278_v47, %v161_v53 }
  0x7c   :  { %v398_v3 = vpop.xlane.xlu0 %33 }
  0x7d   :  { %vm37_vm0 = vcmp.ge.f32.partialorder %v392_v0, %v398_v3  ;;  %vm38_vm1 = vcmp.ge.f32.partialorder %v394_v1, %v398_v3 }
  0x7e   :  { %v47_v4 = vsel %vm37_vm0, -inf, %v392_v0  ;;  %v48_v5 = vsel %vm38_vm1, -inf, %v394_v1  ;;  %v255_v7 = vsel %vm37_vm0, 1.0, %v366_v6  ;;  %v256_v8 = vsel %vm38_vm1, 1.0, %v366_v6  ;;  %vm165_vm0 = vmor %vm163_vm12, %vm164_vm13 }
  0x7f   :  { %v49_v9 = vmax.f32 %v47_v4, %v48_v5  ;;  %v43_v10 = vadd.f32 %v256_v8, %v255_v7  ;;  %vm168_vm1 = vcmp.eq.f32.partialorder %v167_v51, 8.507059e+37  ;;  %v166_v62 = vsel %vm165_vm0, %v278_v47, %v162_v61 }
  0x80   :  { %v171_v63 = vsel %vm168_vm1, %v170_v54, %v166_v62 }
  0x81   :  { %50 = vmax.xlane.f32.xlu0 %v49_v9  ;;  %271 = vpush %v171_v63 }
  0xb2   :  { %s272_s0 = spop %271 }
  0xf4   :  { %v408_v11 = vpop.xlane.xlu0 %50 }
  0xf5   :  { %vm54_vm2 = vcmp.ge.f32.partialorder %v47_v4, %v408_v11  ;;  %vm55_vm3 = vcmp.ge.f32.partialorder %v48_v5, %v408_v11 }
  0xf6   :  { %v64_v12 = vsel %vm54_vm2, -inf, %v47_v4  ;;  %v65_v13 = vsel %vm55_vm3, -inf, %v48_v5  ;;  %v257_v14 = vsel %vm54_vm2, 1.0, %v366_v6  ;;  %v258_v15 = vsel %vm55_vm3, 1.0, %v366_v6 }
  0xf7   :  { %v66_v16 = vmax.f32 %v64_v12, %v65_v13  ;;  %v60_v17 = vadd.f32 %v258_v15, %v257_v14 }
  0xf9   :  { %67 = vmax.xlane.f32.xlu1 %v66_v16 }
 0x16c   :  { %v414_v18 = vpop.xlane.xlu1 %67 }
 0x16d   :  { %vm71_vm4 = vcmp.ge.f32.partialorder %v64_v12, %v414_v18  ;;  %vm72_vm5 = vcmp.ge.f32.partialorder %v65_v13, %v414_v18 }
 0x16e   :  { %v81_v19 = vsel %vm71_vm4, -inf, %v64_v12  ;;  %v82_v20 = vsel %vm72_vm5, -inf, %v65_v13  ;;  %v259_v21 = vsel %vm71_vm4, 1.0, %v366_v6  ;;  %v260_v22 = vsel %vm72_vm5, 1.0, %v366_v6 }
 0x16f   :  { %v83_v23 = vmax.f32 %v81_v19, %v82_v20  ;;  %v77_v24 = vadd.f32 %v260_v22, %v259_v21 }
 0x171   :  { %84 = vmax.xlane.f32.xlu1 %v83_v23 }
 0x179   :  { %44 = vadd.xlane.f32.xlu1 %v43_v10 }
 0x1e4   :  { %v420_v25 = vpop.xlane.xlu1 %84 }
 0x1e5   :  { %vm88_vm6 = vcmp.ge.f32.partialorder %v81_v19, %v420_v25  ;;  %vm89_vm7 = vcmp.ge.f32.partialorder %v82_v20, %v420_v25 }
 0x1e6   :  { %v98_v26 = vsel %vm88_vm6, -inf, %v81_v19  ;;  %v99_v27 = vsel %vm89_vm7, -inf, %v82_v20  ;;  %v261_v28 = vsel %vm88_vm6, 1.0, %v366_v6  ;;  %v262_v29 = vsel %vm89_vm7, 1.0, %v366_v6 }
 0x1e7   :  { %v100_v30 = vmax.f32 %v98_v26, %v99_v27  ;;  %v94_v31 = vadd.f32 %v262_v29, %v261_v28 }
 0x1e9   :  { %101 = vmax.xlane.f32.xlu2 %v100_v30  ;;  %95 = vadd.xlane.f32.xlu1 %v94_v31 }
 0x1ec   :  { %v45_v2 = vpop.xlane.xlu1 %44 }
 0x1ed   :  { %v46_v5 = vsub.f32 8.0, %v45_v2 }
 0x1ef   :  { %vm52_vm2 = vcmp.gt.f32.partialorder %v46_v5, 0.5 }
 0x1f0   :  { %v53_v14 = vsel %vm52_vm2, %v408_v11, %v398_v3  ;;  %v175_v11 = vstv %s272_s0 }
 0x25c   :  { %v426_v32 = vpop.xlane.xlu2 %101  ;;  %v96_v10 = vpop.xlane.xlu1 %95 }
 0x25d   :  { %vm105_vm8 = vcmp.ge.f32.partialorder %v98_v26, %v426_v32  ;;  %vm106_vm9 = vcmp.ge.f32.partialorder %v99_v27, %v426_v32 }
 0x25e   :  { %v115_v33 = vsel %vm105_vm8, -inf, %v98_v26  ;;  %v116_v34 = vsel %vm106_vm9, -inf, %v99_v27  ;;  %v263_v36 = vsel %vm105_vm8, 1.0, %v366_v6  ;;  %v264_v37 = vsel %vm106_vm9, 1.0, %v366_v6 }
 0x25f   :  { %v117_v35 = vmax.f32 %v115_v33, %v116_v34  ;;  %v111_v38 = vadd.f32 %v264_v37, %v263_v36 }
 0x261   :  { %118 = vmax.xlane.f32.xlu2 %v117_v35 }
 0x269   :  { %61 = vadd.xlane.f32.xlu2 %v60_v17 }
 0x271   :  { %112 = vadd.xlane.f32.xlu2 %v111_v38 }
 0x2d4   :  { %v432_v39 = vpop.xlane.xlu2 %118 }
 0x2d5   :  { %vm122_vm10 = vcmp.ge.f32.partialorder %v115_v33, %v432_v39  ;;  %vm123_vm11 = vcmp.ge.f32.partialorder %v116_v34, %v432_v39 }
 0x2d6   :  { %v132_v40 = vsel %vm122_vm10, -inf, %v115_v33  ;;  %v133_v41 = vsel %vm123_vm11, -inf, %v116_v34  ;;  %v265_v43 = vsel %vm122_vm10, 1.0, %v366_v6  ;;  %v266_v44 = vsel %vm123_vm11, 1.0, %v366_v6 }
 0x2d7   :  { %v134_v42 = vmax.f32 %v132_v40, %v133_v41  ;;  %v128_v45 = vadd.f32 %v266_v44, %v265_v43 }
 0x2d9   :  { %135 = vmax.xlane.f32.xlu0 %v134_v42 }
 0x2dc   :  { %v62_v4 = vpop.xlane.xlu2 %61 }
 0x2dd   :  { %v63_v8 = vsub.f32 %v46_v5, %v62_v4 }
 0x2df   :  { %vm69_vm3 = vcmp.gt.f32.partialorder %v63_v8, 0.5 }
 0x2e0   :  { %v70_v16 = vsel %vm69_vm3, %v414_v18, %v53_v14 }
 0x2e1   :  { %78 = vadd.xlane.f32.xlu0 %v77_v24 }
 0x2e9   :  { %129 = vadd.xlane.f32.xlu0 %v128_v45 }
 0x34c   :  { %v136_v52 = vpop.xlane.xlu0 %135 }
 0x34d   :  { %vm139_vm14 = vcmp.ge.f32.partialorder %v132_v40, %v136_v52  ;;  %vm140_vm15 = vcmp.ge.f32.partialorder %v133_v41, %v136_v52 }
 0x34e   :  { %v149_v55 = vsel %vm139_vm14, -inf, %v132_v40  ;;  %v150_v56 = vsel %vm140_vm15, -inf, %v133_v41  ;;  %v267_v57 = vsel %vm139_vm14, 1.0, %v366_v6  ;;  %v268_v58 = vsel %vm140_vm15, 1.0, %v366_v6  ;;  %v113_v6 = vpop.xlane.xlu2 %112 }
 0x34f   :  { %v151_v59 = vmax.f32 %v149_v55, %v150_v56  ;;  %v145_v60 = vadd.f32 %v268_v58, %v267_v57 }
 0x351   :  { %152 = vmax.xlane.f32.xlu2 %v151_v59  ;;  %146 = vadd.xlane.f32.xlu1 %v145_v60 }
 0x354   :  { %v79_v7 = vpop.xlane.xlu0 %78 }
 0x355   :  { %v80_v9 = vsub.f32 %v63_v8, %v79_v7 }
 0x357   :  { %v97_v12 = vsub.f32 %v80_v9, %v96_v10  ;;  %vm86_vm4 = vcmp.gt.f32.partialorder %v80_v9, 0.5 }
 0x358   :  { %v87_v17 = vsel %vm86_vm4, %v420_v25, %v70_v16 }
 0x359   :  { %v114_v15 = vsub.f32 %v97_v12, %v113_v6  ;;  %vm103_vm5 = vcmp.gt.f32.partialorder %v97_v12, 0.5 }
 0x35a   :  { %v104_v20 = vsel %vm103_vm5, %v426_v32, %v87_v17 }
 0x35b   :  { %vm120_vm6 = vcmp.gt.f32.partialorder %v114_v15, 0.5 }
 0x35c   :  { %v130_v13 = vpop.xlane.xlu0 %129  ;;  %v121_v23 = vsel %vm120_vm6, %v432_v39, %v104_v20 }
 0x35d   :  { %v131_v19 = vsub.f32 %v114_v15, %v130_v13 }
 0x35f   :  { %vm137_vm7 = vcmp.gt.f32.partialorder %v131_v19, 0.5 }
 0x360   :  { %v138_v24 = vsel %vm137_vm7, %v136_v52, %v121_v23 }
 0x3c4   :  { %v147_v21 = vpop.xlane.xlu1 %146  ;;  %v153_v26 = vpop.xlane.xlu2 %152 }
 0x3c5   :  { %v148_v22 = vsub.f32 %v131_v19, %v147_v21 }
 0x3c7   :  { %vm154_vm8 = vcmp.gt.f32.partialorder %v148_v22, 0.5 }
 0x3c8   :  { %v155_v3 = vsel %vm154_vm8, %v153_v26, %v138_v24 }
 0x3c9   :  { %v173_v18 = vsub.f32 %v392_v0, %v155_v3  ;;  %v174_v25 = vsub.f32 %v394_v1, %v155_v3 }
 0x3cb   :  { %v176_v27 = vmul.f32 %v175_v11, %v173_v18  ;;  %v177_v28 = vmul.f32 %v175_v11, %v174_v25 }
 0x3cd   :  { %v269_v29 = vmul.f32 -1.442695, %v176_v27  ;;  %v270_v30 = vmul.f32 -1.442695, %v177_v28 }
 0x3cf   :  { %279 = vpow2.f32 %v269_v29 }
 0x3d0   :  { %281 = vpow2.f32 %v270_v30 }
 0x3d5   :  { %v280_v31 = vpop.eup %279 }
 0x3d6   :  { %v282_v32 = vpop.eup %281  ;;  %v184_v33 = vadd.f32 1.0, %v280_v31 }
 0x3d7   :  { %v185_v34 = vadd.f32 1.0, %v282_v32 }
 0x3d8   :  { %283 = vrcp.f32 %v184_v33  ;;  %v197_v41 = vand.u32 2147483648, %v184_v33  ;;  %v195_v43 = vand.u32 2147483647, %v184_v33  ;;  %vm191_vm11 = vweird.f32 %v184_v33 }
 0x3d9   :  { %285 = vrcp.f32 %v185_v34  ;;  %v212_v44 = vand.u32 2147483648, %v185_v34  ;;  %v210_v46 = vand.u32 2147483647, %v185_v34  ;;  %vm206_vm13 = vweird.f32 %v185_v34 }
 0x3da   :  { %v198_v48 = vor.u32 1.1754944e-38, %v197_v41  ;;  %vm196_vm14 = vcmp.eq.f32.partialorder %v195_v43, 8.507059e+37 }
 0x3db   :  { %v213_v51 = vor.u32 1.1754944e-38, %v212_v44  ;;  %vm211_vm0 = vcmp.eq.f32.partialorder %v210_v46, 8.507059e+37 }
 0x3de   :  { %v284_v35 = vpop.eup %283 }
 0x3df   :  { %v286_v36 = vpop.eup %285  ;;  %v187_v37 = vmul.f32 %v284_v35, %v184_v33  ;;  %vm192_vm9 = vweird.f32 %v284_v35 }
 0x3e0   :  { %v202_v38 = vmul.f32 %v286_v36, %v185_v34  ;;  %vm207_vm10 = vweird.f32 %v286_v36  ;;  %vm193_vm12 = vmor %vm191_vm11, %vm192_vm9 }
 0x3e1   :  { %v188_v39 = vsub.f32 1.0, %v187_v37  ;;  %vm208_vm15 = vmor %vm206_vm13, %vm207_vm10 }
 0x3e2   :  { %v203_v40 = vsub.f32 1.0, %v202_v38 }
 0x3e3   :  { %v189_v42 = vmul.f32 %v284_v35, %v188_v39 }
 0x3e4   :  { %v204_v45 = vmul.f32 %v286_v36, %v203_v40 }
 0x3e5   :  { %v190_v47 = vadd.f32 %v284_v35, %v189_v42 }
 0x3e6   :  { %v205_v49 = vadd.f32 %v286_v36, %v204_v45 }
 0x3e7   :  { %v194_v50 = vsel %vm193_vm12, %v284_v35, %v190_v47 }
 0x3e8   :  { %v199_v52 = vsel %vm196_vm14, %v198_v48, %v194_v50  ;;  %v209_v53 = vsel %vm208_vm15, %v286_v36, %v205_v49 }
 0x3e9   :  { %v214_v54 = vsel %vm211_vm0, %v213_v51, %v209_v53  ;;  %v216_v55 = vmul.f32 %v199_v52, %v392_v0 }
 0x3ea   :  { %v217_v56 = vmul.f32 %v214_v54, %v394_v1  ;;  %v220_v57 = vpack.c.bf16 %v214_v54, %v199_v52 }
 0x3eb   :  { %218 = vst [vmem:[#allocation6] sm:$0xff] %v216_v55 }
 0x3ec   :  { %219 = vst [vmem:[#allocation6 + $0x8] sm:$0xff] %v217_v56 }
 0x3ed   :  { %232 = dma.vmem_to_hbm [thread:$0]  %s228_s19, 256, %s230_s22, [#allocation5]   ;;  %221 = vst [vmem:[#allocation7] sm:$0xff] %v220_v57 }
 0x3ee   :  { %243 = dma.vmem_to_hbm [thread:$0]  %s239_s24, 128, %s241_s27, [#allocation8]  }
 0x3ef   :  { %361 = dma.done.wait [#allocation5], 256  }
 0x3f0   :  { %362 = vsyncadd [#allocation5], 4294967040 }
 0x3f1   :  { %363 = dma.done.wait [#allocation8], 128  }
 0x3f2   :  { %364 = vsyncadd [#allocation8], 4294967168 }
 0x3f3   :  { %252 = vsyncpa [#allocation4], 1 }
 0x3f4   :  { %253 = vsyncpa [#allocation5], 1 }
 0x3f5   :  { %254 = vsyncpa [#allocation8], 1 }

</bundles_post_ra>
